<compile_context>
chip_gen: v7x
topology: tpu7x:2x2x1
jax: 0.10.0
libtpu: 0.0.40
codegen_flags: <defaults>
</compile_context>

<pallas_src>
import functools
import math

import jax
import jax.numpy as jnp
from jax import lax
from jax.experimental import pallas as pl
from jax.experimental.pallas import tpu as pltpu

TAU = 0.2                     # InfoNCE temperature (fixed, deterministic)
NORM_EPS = 1e-12              # matches torch.nn.functional.normalize eps
_STAB = 1.0 / TAU             # constant LSE stabilizer: |sim| <= 1/TAU for unit rows
_EXP_NEG_STAB = math.exp(-_STAB)   # contribution of one padded (zero) row/column


def _dual_infonce_kernel(h1_ref, h2c_ref, h2d_ref, out_ref,
                         rowsum_ref, colsum_ref, *,
                         n_true, tm, tn, pad_rows, pad_cols):
    i = pl.program_id(0)          # row-block index (outer)
    j = pl.program_id(1)          # column-block index (inner)
    ni = pl.num_programs(0)
    nj = pl.num_programs(1)
    inv_n = 1.0 / n_true

    @pl.when(jnp.logical_and(i == 0, j == 0))
    def _init():
        out_ref[...] = jnp.zeros_like(out_ref)
        colsum_ref[...] = jnp.zeros_like(colsum_ref)

    @pl.when(j == 0)
    def _row_block_init():
        rowsum_ref[...] = jnp.zeros_like(rowsum_ref)
        # Positive pairs: diag(sim) for this row block via a row-wise O(TM*D)
        # dot (h1n already carries the 1/TAU scale).  Padded rows are zero
        # vectors -> contribute 0, so no mask is needed.
        pos = jnp.sum(h1_ref[...] * h2d_ref[...], axis=-1, keepdims=True)   # [tm, 1]
        out_ref[...] += (-inv_n) * jnp.sum(pos, axis=0, keepdims=True)

    # sim[m, k] = <h1n_m, h2n_k>  (already /TAU).  Contract last dims directly —
    # the MXU consumes the transposed-RHS form natively (no explicit transpose).
    sim = lax.dot_general(h1_ref[...], h2c_ref[...], (((1,), (1,)), ((), ())),
                          preferred_element_type=jnp.float32)               # [tm, tn]

    # One exp pass serves both softmax directions (constant stabilizer).
    p = jnp.exp(sim - _STAB)

    # Row direction: carry across the (inner) column axis.
    rowsum_ref[...] += jnp.sum(p, axis=1, keepdims=True)                    # [tm, 1]

    # Column direction: accumulate across the (outer) row axis into the
    # persistent per-column-block scratch (sublane-indexed by j).
    cs_new = colsum_ref[pl.ds(j, 1), :] + jnp.sum(p, axis=0, keepdims=True)  # [1, tn]
    colsum_ref[pl.ds(j, 1), :] = cs_new

    @pl.when(j == nj - 1)
    def _row_finalize():
        rs = rowsum_ref[...]                                                # [tm, 1]
        if pad_cols > 0:
            # Each padded (zero) h2 column contributed exactly exp(-1/TAU).
            rs = rs - pad_cols * _EXP_NEG_STAB
        if pad_rows > 0:
            row_ids = i * tm + lax.broadcasted_iota(jnp.int32, (tm, 1), 0)
            log_rs = jnp.where(row_ids < n_true,
                               jnp.log(jnp.maximum(rs, 1e-30)), 0.0)
        else:
            log_rs = jnp.log(rs)
        out_ref[...] += (0.5 * inv_n) * jnp.sum(log_rs, axis=0, keepdims=True)

    @pl.when(i == ni - 1)
    def _col_finalize():
        cs = cs_new                                                         # [1, tn]
        if pad_rows > 0:
            # Each padded (zero) h1 row contributed exactly exp(-1/TAU).
            cs = cs - pad_rows * _EXP_NEG_STAB
        if pad_cols > 0:
            col_ids = j * tn + lax.broadcasted_iota(jnp.int32, (1, tn), 1)
            log_cs = jnp.where(col_ids < n_true,
                               jnp.log(jnp.maximum(cs, 1e-30)), 0.0)
        else:
            log_cs = jnp.log(cs)
        out_ref[...] += (0.5 * inv_n) * jnp.sum(log_cs, axis=1, keepdims=True)

    @pl.when(jnp.logical_and(i == ni - 1, j == nj - 1))
    def _add_stabilizer():
        # Both LSE directions carry the same "+1/TAU" stabilizer -> add it once.
        out_ref[...] += _STAB


def _l2_normalize(x):
    x = x.astype(jnp.float32)
    nrm = jnp.maximum(jnp.linalg.norm(x, axis=-1, keepdims=True), NORM_EPS)
    return x / nrm


def _pick_vmem_limit(tm, tn, nj, d):
    """Per-generation VMEM-limit clamp (None when the conservative default is enough)."""
    est = 4 * (2 * tm * d                     # h1 row block (double-buffered)
               + 2 * tn * d                   # streamed normalized-h2 column block
               + 2 * tm * d                   # diag-aligned h2 rows
               + 128 * tm                     # [tm,1] row-sum scratch (lane-padded)
               + ((nj + 7) // 8) * 8 * tn     # column-sum scratch (sublane-padded)
               + 3 * tm * tn                  # sim / exp / partial temporaries
               ) + (2 << 20)                  # margin
    try:
        phys = pltpu.get_tpu_info().vmem_capacity_bytes
    except Exception:
        phys = 64 << 20                       # most conservative (v7x physical)
    cap = int(phys * 0.8)
    if est <= (16 << 20):                     # fits even v5e's default scoped limit
        return None
    return min(est, cap)


def dual_branch_contrast(h1, h2, *, block_rows=256, block_cols=1024):
    """h1, h2: [N, D] embeddings. Returns the scalar DualBranchContrast loss."""
    n, d = h1.shape
    assert h2.shape == (n, d)
    assert block_rows % 8 == 0, "block_rows must be a multiple of 8"
    assert block_cols % 128 == 0, "block_cols must be a multiple of 128"

    # Tile sizes: rows sublane-aligned, columns lane-dense (multiple of 128).
    tm = block_rows if n > block_rows else 8 * pl.cdiv(n, 8)
    tn = block_cols if n > block_cols else 128 * pl.cdiv(n, 128)
    n_pad_r = tm * pl.cdiv(n, tm)
    n_pad_c = tn * pl.cdiv(n, tn)
    ni, nj = n_pad_r // tm, n_pad_c // tn

    # Normalize once in plain JAX (f32, reference eps); fold 1/TAU into the
    # anchor scale so the [TM, TN] tile never needs an extra divide.  Zero-pad
    # afterwards so padded rows/columns are exactly zero vectors.
    h1n = _l2_normalize(h1) * jnp.float32(1.0 / TAU)
    h2n = _l2_normalize(h2)
    if n_pad_r > n:
        h1n = jnp.pad(h1n, ((0, n_pad_r - n), (0, 0)))
    n_pad_2 = max(n_pad_r, n_pad_c)
    if n_pad_2 > n:
        h2n = jnp.pad(h2n, ((0, n_pad_2 - n), (0, 0)))

    kernel = functools.partial(
        _dual_infonce_kernel, n_true=n, tm=tm, tn=tn,
        pad_rows=n_pad_r - n, pad_cols=n_pad_c - n)

    out = pl.pallas_call(
        kernel,
        out_shape=jax.ShapeDtypeStruct((1, 1), jnp.float32),
        grid_spec=pltpu.PrefetchScalarGridSpec(
            num_scalar_prefetch=0,
            grid=(ni, nj),                                        # j is innermost
            in_specs=[
                pl.BlockSpec((tm, d), lambda i, j: (i, 0)),       # h1n row block
                pl.BlockSpec((tn, d), lambda i, j: (j, 0)),       # h2n column block (streamed)
                pl.BlockSpec((tm, d), lambda i, j: (i, 0)),       # h2n rows aligned w/ h1 (positives)
            ],
            out_specs=pl.BlockSpec((1, 1), lambda i, j: (0, 0)),
            scratch_shapes=[
                pltpu.VMEM((tm, 1), jnp.float32),                 # running row exp-sums
                pltpu.VMEM((nj, tn), jnp.float32),                # running column exp-sums
            ],
        ),
        compiler_params=pltpu.CompilerParams(
            dimension_semantics=("arbitrary", "arbitrary"),       # both axes carry accumulators
            vmem_limit_bytes=_pick_vmem_limit(tm, tn, nj, d),
        ),
    )(h1n, h2n, h2n)
    return out[0, 0]


def _reference(h1, h2):
    def norm(x):
        return x / jnp.maximum(jnp.linalg.norm(x, axis=-1, keepdims=True), NORM_EPS)

    def infonce(a, s):
        sim = (norm(a) @ norm(s).T) / TAU
        pos = jnp.diag(sim)
        lse = jax.scipy.special.logsumexp(sim, axis=-1)
        return jnp.mean(lse - pos)

    return 0.5 * (infonce(h1, h2) + infonce(h2, h1))


if __name__ == "__main__":
    key = jax.random.PRNGKey(0)
    k1, k2, k3, k4, k5, k6 = jax.random.split(key, 6)

    # small graph: 8 nodes, 32-dim hidden embeddings (single block, padded cols)
    N, D = 8, 32
    h1 = jax.random.normal(k1, (N, D), dtype=jnp.float32)
    h2 = jax.random.normal(k2, (N, D), dtype=jnp.float32)
    loss = jax.block_until_ready(dual_branch_contrast(h1, h2))
    ref = jax.block_until_ready(_reference(h1, h2))
    assert jnp.allclose(loss, ref, rtol=1e-5, atol=1e-5), (loss, ref)

    # non-divisible N with small row blocks: exercises row tiling, the persistent
    # column-sum accumulator, and the row/column padding corrections.
    g1 = jax.random.normal(k3, (20, D), dtype=jnp.float32)
    g2 = jax.random.normal(k4, (20, D), dtype=jnp.float32)
    loss2 = jax.block_until_ready(dual_branch_contrast(g1, g2, block_rows=8))
    ref2 = jax.block_until_ready(_reference(g1, g2))
    assert jnp.allclose(loss2, ref2, rtol=1e-5, atol=1e-5), (loss2, ref2)

    # full 2-D grid (multiple row AND column blocks) with padding on both axes:
    # exercises the row-sum carry across j and the column finalize at i==last.
    f1 = jax.random.normal(k5, (200, D), dtype=jnp.float32)
    f2 = jax.random.normal(k6, (200, D), dtype=jnp.float32)
    loss3 = jax.block_until_ready(
        dual_branch_contrast(f1, f2, block_rows=64, block_cols=128))
    ref3 = jax.block_until_ready(_reference(f1, f2))
    assert jnp.allclose(loss3, ref3, rtol=1e-5, atol=1e-5), (loss3, ref3)

    print("KERNEL_OK")
</pallas_src>

<mosaic_0001>
module attributes {stable_mosaic.version = 11 : i64} {
  func.func @_dual_infonce_kernel(%arg0: i32, %arg1: i32, %arg2: memref<8x32xf32, #tpu.memory_space<vmem>>, %arg3: memref<128x32xf32, #tpu.memory_space<vmem>>, %arg4: memref<8x32xf32, #tpu.memory_space<vmem>>, %arg5: memref<1x1xf32, #tpu.memory_space<vmem>>, %arg6: memref<8x1xf32, #tpu.memory_space<vmem>>, %arg7: memref<1x128xf32, #tpu.memory_space<vmem>>) attributes {dimension_semantics = [#tpu.dimension_semantics<arbitrary>, #tpu.dimension_semantics<arbitrary>], iteration_bounds = array<i64: 1, 1>, scalar_prefetch = 0 : i64, scratch_operands = 2 : i64, tpu.core_type = #tpu.core_type<tc>, window_params = [{transform_indices = @transform_0, window_bounds = array<i64: 8, 32>}, {transform_indices = @transform_1, window_bounds = array<i64: 128, 32>}, {transform_indices = @transform_2, window_bounds = array<i64: 8, 32>}, {pipeline_mode = #tpu.pipeline_mode<synchronous>, transform_indices = @transform_3, window_bounds = array<i64: 1, 1>}]} {
    %c0_i32 = arith.constant 0 : i32
    %0 = arith.cmpi eq, %arg0, %c0_i32 : i32
    %c0_i32_0 = arith.constant 0 : i32
    %1 = arith.cmpi eq, %arg1, %c0_i32_0 : i32
    %2 = arith.andi %0, %1 : i1
    %3 = arith.extui %2 : i1 to i32
    %c0_i32_1 = arith.constant 0 : i32
    %4 = arith.cmpi ne, %3, %c0_i32_1 : i32
    scf.if %4 {
      %cst_23 = arith.constant 0.000000e+00 : f32
      %37 = vector.broadcast %cst_23 : f32 to vector<1x1xf32>
      %c0_24 = arith.constant 0 : index
      %c0_25 = arith.constant 0 : index
      %38 = vector.load %arg5[%c0_24, %c0_25] : memref<1x1xf32, #tpu.memory_space<vmem>>, vector<1x1xf32>
      tpu.vector_store %arg5[%c0_24, %c0_25], %37 {strides = array<i32>} : memref<1x1xf32, #tpu.memory_space<vmem>>, vector<1x1xf32>,
      %cst_26 = arith.constant 0.000000e+00 : f32
      %39 = vector.broadcast %cst_26 : f32 to vector<1x128xf32>
      %c0_27 = arith.constant 0 : index
      %c0_28 = arith.constant 0 : index
      %40 = vector.load %arg7[%c0_27, %c0_28] : memref<1x128xf32, #tpu.memory_space<vmem>>, vector<1x128xf32>
      tpu.vector_store %arg7[%c0_27, %c0_28], %39 {strides = array<i32>} : memref<1x128xf32, #tpu.memory_space<vmem>>, vector<1x128xf32>,
    } else {
    }
    %c0_i32_2 = arith.constant 0 : i32
    %5 = arith.cmpi eq, %arg1, %c0_i32_2 : i32
    %6 = arith.extui %5 : i1 to i32
    %c0_i32_3 = arith.constant 0 : i32
    %7 = arith.cmpi ne, %6, %c0_i32_3 : i32
    scf.if %7 {
      %cst_23 = arith.constant 0.000000e+00 : f32
      %37 = vector.broadcast %cst_23 : f32 to vector<8x1xf32>
      %c0_24 = arith.constant 0 : index
      %c0_25 = arith.constant 0 : index
      %38 = vector.load %arg6[%c0_24, %c0_25] : memref<8x1xf32, #tpu.memory_space<vmem>>, vector<8x1xf32>
      tpu.vector_store %arg6[%c0_24, %c0_25], %37 {strides = array<i32>} : memref<8x1xf32, #tpu.memory_space<vmem>>, vector<8x1xf32>,
      %c0_26 = arith.constant 0 : index
      %c0_27 = arith.constant 0 : index
      %39 = vector.load %arg2[%c0_26, %c0_27] : memref<8x32xf32, #tpu.memory_space<vmem>>, vector<8x32xf32>
      %c0_28 = arith.constant 0 : index
      %c0_29 = arith.constant 0 : index
      %40 = vector.load %arg4[%c0_28, %c0_29] : memref<8x32xf32, #tpu.memory_space<vmem>>, vector<8x32xf32>
      %41 = arith.mulf %39, %40 : vector<8x32xf32>
      %cst_30 = arith.constant dense<0.000000e+00> : vector<8xf32>
      %42 = vector.multi_reduction <add>, %41, %cst_30 [1] : vector<8x32xf32> to vector<8xf32>
      %43 = vector.shape_cast %42 : vector<8xf32> to vector<8x1xf32>
      %c0_31 = arith.constant 0 : index
      %c0_32 = arith.constant 0 : index
      %44 = vector.load %arg5[%c0_31, %c0_32] : memref<1x1xf32, #tpu.memory_space<vmem>>, vector<1x1xf32>
      %cst_33 = arith.constant dense<0.000000e+00> : vector<1xf32>
      %45 = vector.multi_reduction <add>, %43, %cst_33 [0] : vector<8x1xf32> to vector<1xf32>
      %46 = vector.shape_cast %45 : vector<1xf32> to vector<1x1xf32>
      %cst_34 = arith.constant -1.250000e-01 : f32
      %47 = vector.broadcast %cst_34 : f32 to vector<1x1xf32>
      %48 = arith.mulf %47, %46 : vector<1x1xf32>
      %49 = arith.addf %44, %48 : vector<1x1xf32>
      %c0_35 = arith.constant 0 : index
      %c0_36 = arith.constant 0 : index
      %50 = vector.load %arg5[%c0_35, %c0_36] : memref<1x1xf32, #tpu.memory_space<vmem>>, vector<1x1xf32>
      tpu.vector_store %arg5[%c0_35, %c0_36], %49 {strides = array<i32>} : memref<1x1xf32, #tpu.memory_space<vmem>>, vector<1x1xf32>,
    } else {
    }
    %c0 = arith.constant 0 : index
    %c0_4 = arith.constant 0 : index
    %8 = vector.load %arg2[%c0, %c0_4] : memref<8x32xf32, #tpu.memory_space<vmem>>, vector<8x32xf32>
    %c0_5 = arith.constant 0 : index
    %c0_6 = arith.constant 0 : index
    %9 = vector.load %arg3[%c0_5, %c0_6] : memref<128x32xf32, #tpu.memory_space<vmem>>, vector<128x32xf32>
    %cst = arith.constant dense<0.000000e+00> : vector<8x128xf32>
    %10 = tpu.matmul %8, %9, %cst {dimension_numbers = #tpu.dot_dimension_numbers<[1], [1], [0], [0], [0, 0, 1, 0], [], []>} : vector<8x32xf32>, vector<128x32xf32>, vector<8x128xf32> -> vector<8x128xf32>
    %cst_7 = arith.constant 5.000000e+00 : f32
    %11 = vector.broadcast %cst_7 : f32 to vector<8x128xf32>
    %12 = arith.subf %10, %11 : vector<8x128xf32>
    %13 = math.exp %12 : vector<8x128xf32>
    %c0_8 = arith.constant 0 : index
    %c0_9 = arith.constant 0 : index
    %14 = vector.load %arg6[%c0_8, %c0_9] : memref<8x1xf32, #tpu.memory_space<vmem>>, vector<8x1xf32>
    %cst_10 = arith.constant dense<0.000000e+00> : vector<8xf32>
    %15 = vector.multi_reduction <add>, %13, %cst_10 [1] : vector<8x128xf32> to vector<8xf32>
    %16 = vector.shape_cast %15 : vector<8xf32> to vector<8x1xf32>
    %17 = arith.addf %14, %16 : vector<8x1xf32>
    %c0_11 = arith.constant 0 : index
    %c0_12 = arith.constant 0 : index
    %18 = vector.load %arg6[%c0_11, %c0_12] : memref<8x1xf32, #tpu.memory_space<vmem>>, vector<8x1xf32>
    tpu.vector_store %arg6[%c0_11, %c0_12], %17 {strides = array<i32>} : memref<8x1xf32, #tpu.memory_space<vmem>>, vector<8x1xf32>,
    %19 = arith.index_cast %arg1 : i32 to index
    %c0_13 = arith.constant 0 : index
    %20 = vector.load %arg7[%19, %c0_13] : memref<1x128xf32, #tpu.memory_space<vmem>>, vector<1x128xf32>
    %cst_14 = arith.constant dense<0.000000e+00> : vector<128xf32>
    %21 = vector.multi_reduction <add>, %13, %cst_14 [0] : vector<8x128xf32> to vector<128xf32>
    %22 = vector.shape_cast %21 : vector<128xf32> to vector<1x128xf32>
    %23 = arith.addf %20, %22 : vector<1x128xf32>
    %24 = arith.index_cast %arg1 : i32 to index
    %c0_15 = arith.constant 0 : index
    %25 = vector.load %arg7[%24, %c0_15] : memref<1x128xf32, #tpu.memory_space<vmem>>, vector<1x128xf32>
    tpu.vector_store %arg7[%24, %c0_15], %23 {strides = array<i32>} : memref<1x128xf32, #tpu.memory_space<vmem>>, vector<1x128xf32>,
    %c0_i32_16 = arith.constant 0 : i32
    %26 = arith.cmpi eq, %arg1, %c0_i32_16 : i32
    %27 = arith.extui %26 : i1 to i32
    %c0_i32_17 = arith.constant 0 : i32
    %28 = arith.cmpi ne, %27, %c0_i32_17 : i32
    scf.if %28 {
      %c0_23 = arith.constant 0 : index
      %c0_24 = arith.constant 0 : index
      %37 = vector.load %arg6[%c0_23, %c0_24] : memref<8x1xf32, #tpu.memory_space<vmem>>, vector<8x1xf32>
      %cst_25 = arith.constant 0.808553636 : f32
      %38 = vector.broadcast %cst_25 : f32 to vector<8x1xf32>
      %39 = arith.subf %37, %38 : vector<8x1xf32>
      %40 = math.log %39 : vector<8x1xf32>
      %c0_26 = arith.constant 0 : index
      %c0_27 = arith.constant 0 : index
      %41 = vector.load %arg5[%c0_26, %c0_27] : memref<1x1xf32, #tpu.memory_space<vmem>>, vector<1x1xf32>
      %cst_28 = arith.constant dense<0.000000e+00> : vector<1xf32>
      %42 = vector.multi_reduction <add>, %40, %cst_28 [0] : vector<8x1xf32> to vector<1xf32>
      %43 = vector.shape_cast %42 : vector<1xf32> to vector<1x1xf32>
      %cst_29 = arith.constant 6.250000e-02 : f32
      %44 = vector.broadcast %cst_29 : f32 to vector<1x1xf32>
      %45 = arith.mulf %44, %43 : vector<1x1xf32>
      %46 = arith.addf %41, %45 : vector<1x1xf32>
      %c0_30 = arith.constant 0 : index
      %c0_31 = arith.constant 0 : index
      %47 = vector.load %arg5[%c0_30, %c0_31] : memref<1x1xf32, #tpu.memory_space<vmem>>, vector<1x1xf32>
      tpu.vector_store %arg5[%c0_30, %c0_31], %46 {strides = array<i32>} : memref<1x1xf32, #tpu.memory_space<vmem>>, vector<1x1xf32>,
    } else {
    }
    %c0_i32_18 = arith.constant 0 : i32
    %29 = arith.cmpi eq, %arg0, %c0_i32_18 : i32
    %30 = arith.extui %29 : i1 to i32
    %c0_i32_19 = arith.constant 0 : i32
    %31 = arith.cmpi ne, %30, %c0_i32_19 : i32
    scf.if %31 {
      %c128_i32 = arith.constant 128 : i32
      %37 = arith.muli %arg1, %c128_i32 : i32
      %38 = tpu.iota {dimensions = array<i32: 1>} : vector<1x128xi32>
      %39 = vector.broadcast %37 : i32 to vector<1x128xi32>
      %40 = arith.addi %39, %38 : vector<1x128xi32>
      %c8_i32 = arith.constant 8 : i32
      %41 = vector.broadcast %c8_i32 : i32 to vector<1x128xi32>
      %42 = arith.cmpi slt, %40, %41 : vector<1x128xi32>
      %cst_23 = arith.constant 1.000000e-30 : f32
      %43 = vector.broadcast %cst_23 : f32 to vector<1x128xf32>
      %44 = arith.maximumf %23, %43 : vector<1x128xf32>
      %45 = math.log %44 : vector<1x128xf32>
      %cst_24 = arith.constant 0.000000e+00 : f32
      %46 = vector.broadcast %cst_24 : f32 to vector<1x128xf32>
      %47 = arith.select %42, %45, %46 : vector<1x128xi1>, vector<1x128xf32>
      %c0_25 = arith.constant 0 : index
      %c0_26 = arith.constant 0 : index
      %48 = vector.load %arg5[%c0_25, %c0_26] : memref<1x1xf32, #tpu.memory_space<vmem>>, vector<1x1xf32>
      %cst_27 = arith.constant dense<0.000000e+00> : vector<1xf32>
      %49 = vector.multi_reduction <add>, %47, %cst_27 [1] : vector<1x128xf32> to vector<1xf32>
      %50 = vector.shape_cast %49 : vector<1xf32> to vector<1x1xf32>
      %cst_28 = arith.constant 6.250000e-02 : f32
      %51 = vector.broadcast %cst_28 : f32 to vector<1x1xf32>
      %52 = arith.mulf %51, %50 : vector<1x1xf32>
      %53 = arith.addf %48, %52 : vector<1x1xf32>
      %c0_29 = arith.constant 0 : index
      %c0_30 = arith.constant 0 : index
      %54 = vector.load %arg5[%c0_29, %c0_30] : memref<1x1xf32, #tpu.memory_space<vmem>>, vector<1x1xf32>
      tpu.vector_store %arg5[%c0_29, %c0_30], %53 {strides = array<i32>} : memref<1x1xf32, #tpu.memory_space<vmem>>, vector<1x1xf32>,
    } else {
    }
    %c0_i32_20 = arith.constant 0 : i32
    %32 = arith.cmpi eq, %arg0, %c0_i32_20 : i32
    %c0_i32_21 = arith.constant 0 : i32
    %33 = arith.cmpi eq, %arg1, %c0_i32_21 : i32
    %34 = arith.andi %32, %33 : i1
    %35 = arith.extui %34 : i1 to i32
    %c0_i32_22 = arith.constant 0 : i32
    %36 = arith.cmpi ne, %35, %c0_i32_22 : i32
    scf.if %36 {
      %c0_23 = arith.constant 0 : index
      %c0_24 = arith.constant 0 : index
      %37 = vector.load %arg5[%c0_23, %c0_24] : memref<1x1xf32, #tpu.memory_space<vmem>>, vector<1x1xf32>
      %cst_25 = arith.constant 5.000000e+00 : f32
      %38 = vector.broadcast %cst_25 : f32 to vector<1x1xf32>
      %39 = arith.addf %37, %38 : vector<1x1xf32>
      %c0_26 = arith.constant 0 : index
      %c0_27 = arith.constant 0 : index
      %40 = vector.load %arg5[%c0_26, %c0_27] : memref<1x1xf32, #tpu.memory_space<vmem>>, vector<1x1xf32>
      tpu.vector_store %arg5[%c0_26, %c0_27], %39 {strides = array<i32>} : memref<1x1xf32, #tpu.memory_space<vmem>>, vector<1x1xf32>,
    } else {
    }
    return
  }
  func.func @transform_0(%arg0: i32, %arg1: i32) -> (i32, i32) {
    %c0_i32 = arith.constant 0 : i32
    %c0_i32_0 = arith.constant 0 : i32
    return %arg0, %c0_i32 : i32, i32
  }
  func.func @transform_1(%arg0: i32, %arg1: i32) -> (i32, i32) {
    %c0_i32 = arith.constant 0 : i32
    %c0_i32_0 = arith.constant 0 : i32
    return %arg1, %c0_i32 : i32, i32
  }
  func.func @transform_2(%arg0: i32, %arg1: i32) -> (i32, i32) {
    %c0_i32 = arith.constant 0 : i32
    %c0_i32_0 = arith.constant 0 : i32
    return %arg0, %c0_i32 : i32, i32
  }
  func.func @transform_3(%arg0: i32, %arg1: i32) -> (i32, i32) {
    %c0_i32 = arith.constant 0 : i32
    %c0_i32_0 = arith.constant 0 : i32
    %c0_i32_1 = arith.constant 0 : i32
    return %c0_i32, %c0_i32_0 : i32, i32
  }
}

</mosaic_0001>

<bundles_post_ra>
// kernel: tpu_custom_call.1
= control target key start
LH: loop header
LB: loop body
LE: loop exit
PB: predicated region body
PF: predicated region fallthrough
CT: control target
= control target key end

     0   :  { %vm32_vm0 = vcmask 261120   ;;  %vm21_vm1 = vcmask 0   ;;  %v402_v2 = vmov 0.0|0.0   ;;  %vm27_vm3 = vcmask 7168   ;;  %s524_s0 = inlined_call_operand.vmem [shape: f32[8,32], index: 0, kind: input, shape index: {}]   ;;  %s525_s1 = inlined_call_operand.vmem [shape: f32[128,32], index: 1, kind: input, shape index: {}]   ;;  %s526_s2 = inlined_call_operand.vmem [shape: f32[128,32], index: 2, kind: input, shape index: {}]   ;;  %s527_s3 = inlined_call_operand.hbm [shape: f32[1,1], index: 3, kind: output, shape index: {}]  }
   0x1   :  { %v48_v0 = vld [vmem:[%s525_s1] sm:$0xff]  ;;  %v49_v1 = vld [vmem:[%s525_s1 + $0x8] sm:$0xff]  ;;  %336 = vmatprep.subr.bf16.mxu0 %v402_v2  ;;  %vm434_vm2 = vmpackc.low %vm32_vm0, %vm32_vm0  ;;  %v403_v5 = vmov 0.0   ;;  %vm404_vm4 = vmmov 0  }
   0x2   :  { %v337_v3 = vpack.c.bf16 %v49_v1, %v48_v0  ;;  %22 = vst.msk [vmem:[#allocation4] sm:$0x1] %vm21_vm1, %v403_v5  ;;  %23 = vst [vmem:[#allocation3] sm:$0x1] %v403_v5  ;;  %333 = vmatprep.mubr.msk.f32.mxu0 %vm404_vm4, %v403_v5  ;;  %v50_v6 = vld [vmem:[%s525_s1 + $0x10] sm:$0xff]  ;;  %v51_v7 = vld [vmem:[%s525_s1 + $0x18] sm:$0xff] }
   0x3   :  { %28 = vst.msk [vmem:[#allocation2] sm:$0xff] %vm27_vm3, %v403_v5 }
   0x4   :  { %339 = vmatpush3.bf16.xpose.msk.msra.mxu0 %vm434_vm2, %v337_v3 }
   0x5   :  { %340 = vmatprep.subr.bf16.mxu0 %v402_v2 }
   0x6   :  { %8 = vsyncpa [#allocation5], 0  ;;  %v341_v8 = vpack.c.bf16 %v51_v7, %v50_v6  ;;  %v52_v9 = vld [vmem:[%s525_s1 + $0x20] sm:$0xff]  ;;  %v53_v10 = vld [vmem:[%s525_s1 + $0x28] sm:$0xff]  ;;  %v227_v45 = vlaneseq  ;;  %vm237_vm6 = vcmask 1040384  }
   0x7   :  { %v345_v11 = vpack.c.bf16 %v53_v10, %v52_v9  ;;  %v54_v12 = vld [vmem:[%s525_s1 + $0x30] sm:$0xff]  ;;  %v55_v13 = vld [vmem:[%s525_s1 + $0x38] sm:$0xff]  ;;  %v56_v15 = vld [vmem:[%s525_s1 + $0x40] sm:$0xff] }
   0x8   :  { %v349_v14 = vpack.c.bf16 %v55_v13, %v54_v12  ;;  %v57_v16 = vld [vmem:[%s525_s1 + $0x48] sm:$0xff]  ;;  %v58_v18 = vld [vmem:[%s525_s1 + $0x50] sm:$0xff]  ;;  %v59_v19 = vld [vmem:[%s525_s1 + $0x58] sm:$0xff]  ;;  %v228_v46 = vand.u32 127, %v227_v45 }
   0x9   :  { %v353_v17 = vpack.c.bf16 %v57_v16, %v56_v15  ;;  %v357_v20 = vpack.c.bf16 %v59_v19, %v58_v18  ;;  %v60_v21 = vld [vmem:[%s525_s1 + $0x60] sm:$0xff]  ;;  %v61_v22 = vld [vmem:[%s525_s1 + $0x68] sm:$0xff]  ;;  %v62_v24 = vld [vmem:[%s525_s1 + $0x70] sm:$0xff] }
   0xa   :  { %v361_v23 = vpack.c.bf16 %v61_v22, %v60_v21  ;;  %v63_v25 = vld [vmem:[%s525_s1 + $0x78] sm:$0xff]  ;;  %v47_v27 = vld [vmem:[%s524_s0] sm:$0xff]  ;;  %v195_v41 = vld [vmem:[#allocation3] sm:$0x1]  ;;  %vm231_vm5 = vcmp.lt.s32.totalorder %v228_v46, 8  ;;  %s405_s0 = smov [#allocation4]  }
   0xb   :  { %v365_v26 = vpack.c.bf16 %v63_v25, %v62_v24  ;;  %v30_v32 = vld [vmem:[%s526_s2] sm:$0xff]  ;;  %v36_v63 = vld [vmem:[#allocation4] sm:$0x1]  ;;  %s257_s1 = sshll.u32 %s405_s0, 4  ;;  %s258_s1 = int_to_ptr.vmem [resolvable:$true] %s257_s1 }
   0xc   :  { %343 = vmatpush3.bf16.xpose.msk.msra.mxu0 %vm434_vm2, %v341_v8  ;;  %v31_v33 = vmul.f32 %v47_v27, %v30_v32  ;;  %v189_v51 = vld [vmem:[#allocation2] sm:$0xff]  ;;  %s378_s2 = scalar_lea.vmem %s258_s1, 16  ;;  %s382_s21 = scalar_lea.vmem %s258_s1, 32 }
   0xd   :  { %344 = vmatprep.subr.bf16.mxu0 %v402_v2  ;;  %p379_p0 = scmp.ne.s32.totalorder %s258_s1, %s378_s2  ;;  %p383_p1 = scmp.lt.s32.totalorder %s258_s1, %s258_s1 }
   0xe   :  { %v33_v36 = vsel %vm32_vm0, %v31_v33, 0.0  ;;  %p384_p2 = scmp.lt.s32.totalorder %s382_s21, %s378_s2 }
  0x10   :  { %p385_p3 = por %p384_p2, %p383_p1 }
  0x12   :  { %p386_p4 = pnand %p385_p3, %p379_p0 }
  0x14   :  { %347 = vmatpush3.bf16.xpose.msk.msra.mxu0 %vm434_vm2, %v345_v11 }
  0x15   :  { %348 = vmatprep.subr.bf16.mxu0 %v402_v2 }
  0x1c   :  { %351 = vmatpush3.bf16.xpose.msk.msra.mxu0 %vm434_vm2, %v349_v14 }
  0x1d   :  { %352 = vmatprep.subr.bf16.mxu0 %v402_v2 }
  0x24   :  { %355 = vmatpush3.bf16.xpose.msk.msra.mxu0 %vm434_vm2, %v353_v17 }
  0x25   :  { %356 = vmatprep.subr.bf16.mxu0 %v402_v2 }
  0x2c   :  { %359 = vmatpush3.bf16.xpose.msk.msra.mxu0 %vm434_vm2, %v357_v20 }
  0x2d   :  { %360 = vmatprep.subr.bf16.mxu0 %v402_v2 }
  0x34   :  { %363 = vmatpush3.bf16.xpose.msk.msra.mxu0 %vm434_vm2, %v361_v23 }
  0x35   :  { %364 = vmatprep.subr.bf16.mxu0 %v402_v2 }
  0x3c   :  { %367 = vmatpush3.bf16.xpose.msk.msra.mxu0 %vm434_vm2, %v365_v26 }
  0x43   :  { %334 = vmatmul.mubr.msk.f32.vlgmr.msra.gmra.mrb[0].mxu0 %vm32_vm0, %v47_v27 }
 0x116   :  { %v182_v28 = vpop.f32.mrb[0].mxu0 }
 0x117   :  { %v282_v29 = vadd.f32 -5.0, %v182_v28  ;;  %v335_v30 = vpop.f32.mrb[1].mxu0 }
 0x119   :  { %v187_v31 = vmul.f32 1.442695, %v282_v29 }
 0x11b   :  { %372 = vpow2.f32 %v187_v31 }
 0x125   :  { %v373_v34 = vpop.eup %372 }
 0x126   :  { %190 = vadd.xlane.f32.xlu0 %v373_v34  ;;  %v196_v35 = vrot.slane %v373_v34, 4 }
 0x128   :  { %v197_v37 = vadd.f32 %v373_v34, %v196_v35 }
 0x12a   :  { %34 = vadd.xlane.f32.xlu0 %v33_v36  ;;  %v198_v38 = vrot.slane %v197_v37, 2 }
 0x12c   :  { %v199_v39 = vadd.f32 %v198_v38, %v197_v37 }
 0x12e   :  { %v200_v40 = vrot.slane %v199_v39, 1 }
 0x130   :  { %v201_v42 = vadd.f32 %v200_v40, %v199_v39 }
 0x132   :  { %v202_v43 = vadd.f32 %v201_v42, %v195_v41 }
 0x134   :  { %v232_v44 = vmax.f32 %v202_v43, 1e-30  ;;  %203 = vst [vmem:[#allocation3] sm:$0x1] %v202_v43 }
 0x136   :  { %374 = vlog2.f32 %v232_v44 }
 0x140   :  { %v375_v47 = vpop.eup %374 }
 0x141   :  { %v234_v48 = vmul.f32 0.6931472, %v375_v47 }
 0x143   :  { %v235_v49 = vsel %vm231_vm5, %v234_v48, 0.0 }
 0x144   :  { %v238_v50 = vsel %vm237_vm6, %v235_v49, 0.0 }
 0x145   :  { %239 = vadd.xlane.f32.xlu1 %v238_v50 }
 0x1b3   :  { %v191_v52 = vpop.xlane.xlu0 %190 }
 0x1b4   :  { %v192_v53 = vadd.f32 %v191_v52, %v189_v51 }
 0x1b6   :  { %194 = vst.msk [vmem:[#allocation2] sm:$0xff] %vm27_vm3, %v192_v53 }
 0x1b7   :  { %v35_v54 = vpop.xlane.xlu0 %34 }
 0x1b8   :  { %v37_v55 = vrot.slane %v35_v54, 4 }
 0x1ba   :  { %v38_v56 = vadd.f32 %v37_v55, %v35_v54 }
 0x1bc   :  { %v39_v57 = vrot.slane %v38_v56, 2 }
 0x1bd   :  { %v207_v58 = vld [vmem:[#allocation2] sm:$0xff] }
 0x1be   :  { %v283_v59 = vadd.f32 -0.80855364, %v207_v58  ;;  %v40_v60 = vadd.f32 %v39_v57, %v38_v56 }
 0x1c0   :  { %v41_v61 = vrot.slane %v40_v60, 1  ;;  %376 = vlog2.f32 %v283_v59 }
 0x1c2   :  { %v42_v62 = vadd.f32 %v41_v61, %v40_v60 }
 0x1c4   :  { %v43_v0 = vmul.f32 -0.125, %v42_v62 }
 0x1c6   :  { %v44_v1 = vadd.f32 %v43_v0, %v36_v63 }
 0x1c8   :  { %46 = vst.msk [vmem:[#allocation4] sm:$0x1] %vm21_vm1, %v44_v1 }
 0x1ca   :  { %v377_v2 = vpop.eup %376 }
 0x1cb   :  { %v210_v3 = vmul.f32 0.6931472, %v377_v2 }
 0x1cd   :  { %v212_v4 = vsel %vm27_vm3, %v210_v3, 0.0 }
 0x1ce   :  { %v213_v5 = vrot.slane %v212_v4, 4 }
 0x1cf   :  { %v211_v12 = vld [vmem:[#allocation4] sm:$0x1] }
 0x1d0   :  { %v214_v6 = vadd.f32 %v213_v5, %v212_v4 }
 0x1d2   :  { %v215_v7 = vrot.slane %v214_v6, 2  ;;  %v240_v14 = vpop.xlane.xlu1 %239 }
 0x1d3   :  { %v241_v15 = vmul.f32 0.0625, %v240_v14 }
 0x1d4   :  { %v216_v8 = vadd.f32 %v215_v7, %v214_v6 }
 0x1d6   :  { %v217_v9 = vrot.slane %v216_v8, 1 }
 0x1d8   :  { %v218_v10 = vadd.f32 %v217_v9, %v216_v8 }
 0x1da   :  { %v219_v11 = vmul.f32 0.0625, %v218_v10 }
 0x1dc   :  { %v220_v13 = vadd.f32 %v219_v11, %v211_v12 }
 0x1de   :  { %222 = vst.msk [vmem:[#allocation4] sm:$0x1] %vm21_vm1, %v220_v13 }
 0x1e5   :  { %v236_v16 = vld [vmem:[#allocation4] sm:$0x1] }
 0x1e6   :  { %v242_v17 = vadd.f32 %v241_v15, %v236_v16 }
 0x1e8   :  { %244 = vst.msk [vmem:[#allocation4] sm:$0x1] %vm21_vm1, %v242_v17 }
 0x1ef   :  { %v247_v18 = vld [vmem:[#allocation4] sm:$0x1] }
 0x1f0   :  { %v248_v19 = vadd.f32 5.0, %v247_v18 }
 0x1f2   :  { %250 = vst.msk [vmem:[#allocation4] sm:$0x1] %vm21_vm1, %v248_v19 }
 0x1f3   :  { %389 = shalt.err (!%p386_p4)
}
 0x1f4   :  { %s390_s24 = scalar_lea.hbm %s527_s3, 16 }
 0x1f5   :  { %p391_p5 = scmp.ne.s32.totalorder %s527_s3, %s390_s24  ;;  %p394_p6 = scmp.lt.u32.totalorder %s390_s24, %s527_s3 }
 0x1f7   :  { %p396_p7 = pnand %p394_p6, %p391_p5 }
 0x1f9   :  { %399 = shalt.err (!%p396_p7)
}
 0x1fa   :  { %260 = dma.vmem_to_hbm [thread:$0]  %s258_s1, 16, %s527_s3, [#allocation5]  }
 0x1fb   :  { %400 = dma.done.wait [#allocation5], 16  }
 0x1fc   :  { %401 = vsyncadd [#allocation5], 4294967280 }
 0x1fd   :  { %264 = vsyncpa [#allocation5], 1 }

</bundles_post_ra>
